<compile_context>
chip_gen: v5e
topology: v5e:2x2
jax: 0.10.0
libtpu: 0.0.40
codegen_flags: <defaults>
</compile_context>

<pallas_src>
import functools

import jax
import jax.numpy as jnp
from jax.experimental import pallas as pl
from jax.experimental.pallas import tpu as pltpu


def _cdiv(a, b):
    return -(-a // b)


def _round_up(a, b):
    return _cdiv(a, b) * b


def _vmem_budget_bytes():
    # Per-input-block byte budget (the pipeline double-buffers it).
    # v7x has only 64 MiB VMEM per TensorCore -> use a smaller budget there.
    try:
        kind = jax.devices()[0].device_kind.lower()
    except Exception:
        kind = ""
    if "v7" in kind:
        return 4 * 1024 * 1024
    return 8 * 1024 * 1024


def _gap_kernel(x_ref, o_ref, acc_ref, *, inv_hw):
    # Grid = (row_tiles, hw_tiles); the hw (reduction) axis is last.
    k = pl.program_id(1)

    @pl.when(k == 0)
    def _():
        acc_ref[...] = jnp.zeros_like(acc_ref)

    # Accumulate partial row-sums in f32.
    acc_ref[...] += jnp.sum(x_ref[...].astype(jnp.float32), axis=-1, keepdims=True)

    @pl.when(k == pl.num_programs(1) - 1)
    def _():
        o_ref[...] = (acc_ref[...] * inv_hw).astype(o_ref.dtype)


def global_avg_pool(x, *, hw_tile_cap=4096, min_bytes_for_pallas=1 << 20):
    """x: (B, C, H, W) -> (B, C), mean over H and W (== torch.mean(x, [-2,-1]))."""
    B, C, H, W = x.shape
    rows = B * C
    hw = H * W
    itemsize = jnp.dtype(x.dtype).itemsize

    # Tiny inputs: kernel-launch + pipeline prologue dominate; XLA's fused
    # reduction is already optimal.
    if rows * hw * itemsize < min_bytes_for_pallas:
        return jnp.mean(x, axis=(-2, -1))

    # ---- hw (lane / reduction-axis) tiling: cap tile width, pad to x128 ----
    assert hw_tile_cap % 128 == 0
    if hw <= hw_tile_cap:
        n_hw = 1
        tile_hw = _round_up(hw, 128)
    else:
        n_hw = _cdiv(hw, hw_tile_cap)
        tile_hw = _round_up(_cdiv(hw, n_hw), 128)
    padded_hw = tile_hw * n_hw

    # ---- row (sublane / parallel-axis) tiling: VMEM-budget driven ----
    budget = _vmem_budget_bytes()
    tile_rows = max(8, (budget // (tile_hw * itemsize)) // 8 * 8)
    rows_ceil = _round_up(rows, 8)
    tile_rows = min(tile_rows, rows_ceil)
    # Keep >=2 row tiles when possible so the "parallel" axis can be sharded
    # across TensorCores (v7x megacore).
    if rows_ceil >= 16 and tile_rows >= rows_ceil:
        tile_rows = _round_up(_cdiv(rows_ceil, 2), 8)
    padded_rows = _round_up(rows, tile_rows)
    n_rows = padded_rows // tile_rows

    # ---- flatten + zero-pad (zeros are sum-neutral; divisor stays hw) ----
    x2 = x.reshape(rows, hw)
    if padded_rows != rows or padded_hw != hw:
        x2 = jnp.pad(x2, ((0, padded_rows - rows), (0, padded_hw - hw)))

    in_block_bytes = tile_rows * tile_hw * itemsize
    # ~2.2x input block (double-buffered input) + headroom for output/scratch.
    vmem_limit = max(16 * 1024 * 1024, int(2.5 * in_block_bytes) + (2 << 20))

    kernel = functools.partial(_gap_kernel, inv_hw=float(1.0 / hw))

    out = pl.pallas_call(
        kernel,
        out_shape=jax.ShapeDtypeStruct((padded_rows, 1), x.dtype),
        grid_spec=pltpu.PrefetchScalarGridSpec(
            num_scalar_prefetch=0,
            grid=(n_rows, n_hw),
            in_specs=[pl.BlockSpec((tile_rows, tile_hw), lambda i, k: (i, k))],
            out_specs=pl.BlockSpec((tile_rows, 1), lambda i, k: (i, 0)),
            scratch_shapes=[pltpu.VMEM((tile_rows, 1), jnp.float32)],
        ),
        compiler_params=pltpu.CompilerParams(
            dimension_semantics=("parallel", "arbitrary"),
            vmem_limit_bytes=vmem_limit,
        ),
    )(x2)

    return out[:rows, 0].reshape(B, C)


if __name__ == "__main__":
    key = jax.random.PRNGKey(0)
    B, C, H, W = 2, 4, 16, 16
    x = jax.random.normal(key, (B, C, H, W), dtype=jnp.float32)
    y_ref = jnp.mean(x, axis=(-2, -1))

    # 1) Force the Pallas path at this small size and check correctness.
    y = jax.block_until_ready(global_avg_pool(x, min_bytes_for_pallas=0))
    assert y.shape == (B, C), y.shape
    assert jnp.allclose(y, y_ref, atol=1e-5, rtol=1e-5)

    # 2) Default path (tiny input -> bypass) must also match.
    y_bypass = jax.block_until_ready(global_avg_pool(x))
    assert jnp.allclose(y_bypass, y_ref, atol=1e-5, rtol=1e-5)

    # 3) Exercise row padding (B*C not a multiple of 8) and multi-tile hw
    #    reduction (small hw_tile_cap forces several reduction steps).
    x2 = jax.random.normal(jax.random.PRNGKey(1), (3, 5, 24, 24), dtype=jnp.float32)
    y2 = jax.block_until_ready(
        global_avg_pool(x2, min_bytes_for_pallas=0, hw_tile_cap=256)
    )
    y2_ref = jnp.mean(x2, axis=(-2, -1))
    assert y2.shape == (3, 5), y2.shape
    assert jnp.allclose(y2, y2_ref, atol=1e-5, rtol=1e-5)

    print("KERNEL_OK")
</pallas_src>

<mosaic_0001>
module attributes {stable_mosaic.version = 11 : i64} {
  func.func @_gap_kernel(%arg0: i32, %arg1: i32, %arg2: memref<8x256xf32, #tpu.memory_space<vmem>>, %arg3: memref<8x1xf32, #tpu.memory_space<vmem>>, %arg4: memref<8x1xf32, #tpu.memory_space<vmem>>) attributes {dimension_semantics = [#tpu.dimension_semantics<parallel>, #tpu.dimension_semantics<arbitrary>], iteration_bounds = array<i64: 1, 1>, scalar_prefetch = 0 : i64, scratch_operands = 1 : i64, tpu.core_type = #tpu.core_type<tc>, window_params = [{transform_indices = @transform_0, window_bounds = array<i64: 8, 256>}, {transform_indices = @transform_1, window_bounds = array<i64: 8, 1>}]} {
    %c0_i32 = arith.constant 0 : i32
    %0 = arith.cmpi eq, %arg1, %c0_i32 : i32
    %1 = arith.extui %0 : i1 to i32
    %c0_i32_0 = arith.constant 0 : i32
    %2 = arith.cmpi ne, %1, %c0_i32_0 : i32
    scf.if %2 {
      %cst_8 = arith.constant 0.000000e+00 : f32
      %12 = vector.broadcast %cst_8 : f32 to vector<8x1xf32>
      %c0_9 = arith.constant 0 : index
      %c0_10 = arith.constant 0 : index
      %13 = vector.load %arg4[%c0_9, %c0_10] : memref<8x1xf32, #tpu.memory_space<vmem>>, vector<8x1xf32>
      tpu.vector_store %arg4[%c0_9, %c0_10], %12 {strides = array<i32>} : memref<8x1xf32, #tpu.memory_space<vmem>>, vector<8x1xf32>,
    } else {
    }
    %c0 = arith.constant 0 : index
    %c0_1 = arith.constant 0 : index
    %3 = vector.load %arg4[%c0, %c0_1] : memref<8x1xf32, #tpu.memory_space<vmem>>, vector<8x1xf32>
    %c0_2 = arith.constant 0 : index
    %c0_3 = arith.constant 0 : index
    %4 = vector.load %arg2[%c0_2, %c0_3] : memref<8x256xf32, #tpu.memory_space<vmem>>, vector<8x256xf32>
    %cst = arith.constant dense<0.000000e+00> : vector<8xf32>
    %5 = vector.multi_reduction <add>, %4, %cst [1] : vector<8x256xf32> to vector<8xf32>
    %6 = vector.shape_cast %5 : vector<8xf32> to vector<8x1xf32>
    %7 = arith.addf %3, %6 : vector<8x1xf32>
    %c0_4 = arith.constant 0 : index
    %c0_5 = arith.constant 0 : index
    %8 = vector.load %arg4[%c0_4, %c0_5] : memref<8x1xf32, #tpu.memory_space<vmem>>, vector<8x1xf32>
    tpu.vector_store %arg4[%c0_4, %c0_5], %7 {strides = array<i32>} : memref<8x1xf32, #tpu.memory_space<vmem>>, vector<8x1xf32>,
    %c0_i32_6 = arith.constant 0 : i32
    %9 = arith.cmpi eq, %arg1, %c0_i32_6 : i32
    %10 = arith.extui %9 : i1 to i32
    %c0_i32_7 = arith.constant 0 : i32
    %11 = arith.cmpi ne, %10, %c0_i32_7 : i32
    scf.if %11 {
      %c0_8 = arith.constant 0 : index
      %c0_9 = arith.constant 0 : index
      %12 = vector.load %arg4[%c0_8, %c0_9] : memref<8x1xf32, #tpu.memory_space<vmem>>, vector<8x1xf32>
      %cst_10 = arith.constant 3.906250e-03 : f32
      %13 = vector.broadcast %cst_10 : f32 to vector<8x1xf32>
      %14 = arith.mulf %12, %13 : vector<8x1xf32>
      %c0_11 = arith.constant 0 : index
      %c0_12 = arith.constant 0 : index
      %15 = vector.load %arg3[%c0_11, %c0_12] : memref<8x1xf32, #tpu.memory_space<vmem>>, vector<8x1xf32>
      tpu.vector_store %arg3[%c0_11, %c0_12], %14 {strides = array<i32>} : memref<8x1xf32, #tpu.memory_space<vmem>>, vector<8x1xf32>,
    } else {
    }
    return
  }
  func.func @transform_0(%arg0: i32, %arg1: i32) -> (i32, i32) {
    %c0_i32 = arith.constant 0 : i32
    return %arg0, %arg1 : i32, i32
  }
  func.func @transform_1(%arg0: i32, %arg1: i32) -> (i32, i32) {
    %c0_i32 = arith.constant 0 : i32
    %c0_i32_0 = arith.constant 0 : i32
    return %arg0, %c0_i32 : i32, i32
  }
}

</mosaic_0001>

<bundles_post_ra>
// kernel: tpu_custom_call.1
= control target key start
LH: loop header
LB: loop body
LE: loop exit
PB: predicated region body
PF: predicated region fallthrough
CT: control target
= control target key end

     0   :  { %6 = vsyncpa [#allocation4], 0  ;;  %s76_s9 = smov [#allocation3]   ;;  %s94_s0 = inlined_call_operand.hbm [shape: f32[8,256], index: 0, kind: input, shape index: {}]   ;;  %s95_s1 = inlined_call_operand.vmem [shape: f32[8,1], index: 1, kind: output, shape index: {}]  }
   0x1   :  { %s12_s8 = sshll.u32 %s94_s0, 4  ;;  %s14_s10 = sshll.u32 %s76_s9, 4  ;;  %s13_s8 = int_to_ptr.hbm [resolvable:$true] %s12_s8  ;;  %s15_s10 = int_to_ptr.vmem [resolvable:$true] %s14_s10 }
   0x2   :  { %17 = dma.hbm_to_vmem [thread:$0]  %s13_s8, 256, %s15_s10, [#allocation4]  }
   0x3   :  { %74 = dma.done.wait [#allocation4], 256  }
   0x4   :  { %75 = vsyncadd [#allocation4], 4294967040  ;;  %vm26_vm0 = vcmask 7168   ;;  %v77_v0 = vmov 0.0   ;;  %v29_v1 = vld [vmem:[#allocation3] sm:$0xff]  ;;  %v30_v2 = vld [vmem:[#allocation3 + $0x8] sm:$0xff] }
   0x5   :  { %27 = vst.msk [vmem:[#allocation2] sm:$0xff] %vm26_vm0, %v77_v0  ;;  %v31_v3 = vadd.f32 %v30_v2, %v29_v1 }
   0x7   :  { %32 = vadd.xlane.f32.xlu0 %v31_v3 }
   0xc   :  { %v28_v4 = vld [vmem:[#allocation2] sm:$0xff] }
  0x7a   :  { %v33_v5 = vpop.xlane.xlu0 %32 }
  0x7b   :  { %v34_v6 = vadd.f32 %v33_v5, %v28_v4 }
  0x7d   :  { %36 = vst.msk [vmem:[#allocation2] sm:$0xff] %vm26_vm0, %v34_v6 }
  0x84   :  { %v40_v7 = vld [vmem:[#allocation2] sm:$0xff] }
  0x85   :  { %v41_v8 = vmul.f32 0.00390625, %v40_v7 }
  0x87   :  { %42 = vst.msk [vmem:[%s95_s1] sm:$0xff] %vm26_vm0, %v41_v8 }
  0x88   :  { %47 = vsyncpa [#allocation4], 1 }

</bundles_post_ra>
